<compile_context>
chip_gen: v5e
topology: v5e:2x2
jax: 0.10.0
libtpu: 0.0.40
codegen_flags: <defaults>
</compile_context>

<pallas_src>
import math

import jax
import jax.numpy as jnp
from jax.experimental import pallas as pl
from jax.experimental.pallas import tpu as pltpu

FEATURE_DICT = {"resnet18": 512, "resnet34": 512, "resnet50": 2048, "resnet101": 2048}

# Above this many f32 activation bytes the grid is split into >= 2 "parallel"
# M steps (so the two v7x TensorCores can both be used).
_SPLIT_X_BYTES = 2 * 1024 * 1024


def _round_up(x, m):
    return ((x + m - 1) // m) * m


def _linear_kernel(x_ref, w_ref, b_ref, o_ref):
    # Activation arrives f32 (read from HBM once); cast to bf16 on the VPU
    # immediately before the MXU dot.  Accumulate + bias add stay in f32
    # (v5e has no bf16 VPU ALU, and we want full-precision logits).
    x_bf16 = x_ref[...].astype(jnp.bfloat16)
    acc = jnp.dot(x_bf16, w_ref[...], preferred_element_type=jnp.float32)
    o_ref[...] = acc + b_ref[...]


def _choose_tile(m, k):
    """Pick the M tile size and grid length for an (m, k) activation."""
    if m * k * 4 <= _SPLIT_X_BYTES:
        # Single grid step; block M == full array dim waives the (8,128) rule,
        # Mosaic pads inside VMEM (no HBM-side jnp.pad needed).
        return m, 1
    # Tiled path: big tiles (~4-8 MiB f32 x-tile) amortise per-step overhead,
    # and at least 2 steps so the "parallel" axis can shard across v7x cores.
    tm_big = 2048 if k <= 1024 else 1024
    tm = min(tm_big, _round_up(pl.cdiv(m, 2), 8))   # multiple of 8 (sublane)
    return tm, pl.cdiv(m, tm)


def pallas_linear(x, w, b):
    """y = x @ w + b with x:(M,K) f32, w:(K,N) bf16, b:(1,N) f32 -> (M,N) f32.

    N must be a multiple of 128 (classes are padded by the caller).
    """
    M, K = x.shape
    Kw, N = w.shape
    assert K == Kw, (K, Kw)
    tm, grid_m = _choose_tile(M, K)

    cost = pl.CostEstimate(
        flops=2 * M * K * N,
        transcendentals=0,
        bytes_accessed=M * K * 4 + K * N * 2 + N * 4 + M * N * 4,
    )

    return pl.pallas_call(
        _linear_kernel,
        out_shape=jax.ShapeDtypeStruct((M, N), jnp.float32),
        grid_spec=pltpu.PrefetchScalarGridSpec(
            num_scalar_prefetch=0,
            grid=(grid_m,),
            in_specs=[
                pl.BlockSpec((tm, K), lambda i: (i, 0)),   # activation tile
                pl.BlockSpec((K, N), lambda i: (0, 0)),    # whole weight, resident
                pl.BlockSpec((1, N), lambda i: (0, 0)),    # whole bias, resident
            ],
            out_specs=pl.BlockSpec((tm, N), lambda i: (i, 0)),
        ),
        compiler_params=pltpu.CompilerParams(
            dimension_semantics=("parallel",),   # shard M across cores on v7x
        ),
        cost_estimate=cost,
    )(x, w, b)


class DomainNetClassifierPallas:
    """JAX/Pallas equivalent of models/domainnet.py::DomainNetClassifier."""

    def __init__(self, backbone, classes=126, *, key=None):
        in_features = FEATURE_DICT[backbone]
        self.in_features = in_features
        self.classes = classes
        self.n_pad = _round_up(max(classes, 128), 128)

        if key is None:
            key = jax.random.PRNGKey(0)
        k_w, k_b = jax.random.split(key)
        # Deterministic init mirroring torch.nn.Linear default U(-1/sqrt(fan_in), +).
        bound = 1.0 / math.sqrt(in_features)
        # PyTorch weight is (classes, in_features); we store its transpose (K, N).
        weight_t = jax.random.uniform(
            k_w, (in_features, classes), jnp.float32, -bound, bound
        )
        self.bias = jax.random.uniform(k_b, (classes,), jnp.float32, -bound, bound)

        # Padded / bf16-cast parameters built ONCE here; hot path stays clean.
        self.w_pad = (
            jnp.zeros((in_features, self.n_pad), jnp.bfloat16)
            .at[:, :classes]
            .set(weight_t.astype(jnp.bfloat16))
        )
        self.b_pad = (
            jnp.zeros((1, self.n_pad), jnp.float32).at[0, :classes].set(self.bias)
        )

    def __call__(self, feature):
        # torch.flatten(feature, 1)
        B = feature.shape[0]
        x = feature.reshape(B, -1).astype(jnp.float32)
        assert x.shape[1] == self.in_features, (
            f"flattened feature dim {x.shape[1]} != expected {self.in_features}"
        )
        # No HBM-side cast / pad: the kernel reads f32 once and casts in VMEM.
        y_p = pallas_linear(x, self.w_pad, self.b_pad)
        # Column slice back to the true class count (rows were never padded).
        return y_p[:, : self.classes]


if __name__ == "__main__":
    key = jax.random.PRNGKey(0)
    k_in, k_model = jax.random.split(key)

    # Small, module-consistent shapes: resnet18 backbone -> 512 features,
    # NCHW feature map (B, 512, 1, 1) that forward() flattens.
    B = 4
    feature = jax.random.normal(k_in, (B, 512, 1, 1), jnp.float32)

    model = DomainNetClassifierPallas("resnet18", classes=126, key=k_model)
    out = jax.block_until_ready(model(feature))

    # Reference in plain JAX using the same bf16 weight / in-kernel bf16 x cast.
    x_ref = feature.reshape(B, -1).astype(jnp.bfloat16).astype(jnp.float32)
    w_ref = model.w_pad[:, : model.classes].astype(jnp.float32)
    ref = x_ref @ w_ref + model.bias
    assert out.shape == (B, 126), out.shape
    assert jnp.allclose(out, ref, atol=2e-2, rtol=2e-2), "mismatch vs reference"

    print("KERNEL_OK")
</pallas_src>

<mosaic_0001>
module attributes {stable_mosaic.version = 11 : i64} {
  func.func @_linear_kernel(%arg0: i32, %arg1: memref<4x512xf32, #tpu.memory_space<vmem>>, %arg2: memref<512x128xbf16, #tpu.memory_space<vmem>>, %arg3: memref<1x128xf32, #tpu.memory_space<vmem>>, %arg4: memref<4x128xf32, #tpu.memory_space<vmem>>) attributes {dimension_semantics = [#tpu.dimension_semantics<parallel>], iteration_bounds = array<i64: 1>, scalar_prefetch = 0 : i64, scratch_operands = 0 : i64, tpu.core_type = #tpu.core_type<tc>, window_params = [{transform_indices = @transform_0, window_bounds = array<i64: 4, 512>}, {pipeline_mode = #tpu.pipeline_mode<synchronous>, transform_indices = @transform_1, window_bounds = array<i64: 512, 128>}, {pipeline_mode = #tpu.pipeline_mode<synchronous>, transform_indices = @transform_2, window_bounds = array<i64: 1, 128>}, {transform_indices = @transform_3, window_bounds = array<i64: 4, 128>}]} {
    %c0 = arith.constant 0 : index
    %c0_0 = arith.constant 0 : index
    %0 = vector.load %arg1[%c0, %c0_0] : memref<4x512xf32, #tpu.memory_space<vmem>>, vector<4x512xf32>
    %1 = arith.truncf %0 : vector<4x512xf32> to vector<4x512xbf16>
    %c0_1 = arith.constant 0 : index
    %c0_2 = arith.constant 0 : index
    %2 = vector.load %arg2[%c0_1, %c0_2] : memref<512x128xbf16, #tpu.memory_space<vmem>>, vector<512x128xbf16>
    %cst = arith.constant dense<0.000000e+00> : vector<4x128xf32>
    %3 = tpu.matmul %1, %2, %cst {dimension_numbers = #tpu.dot_dimension_numbers<[1], [0], [0], [1], [0, 0, 1, 1], [], []>} : vector<4x512xbf16>, vector<512x128xbf16>, vector<4x128xf32> -> vector<4x128xf32>
    %c0_3 = arith.constant 0 : index
    %c0_4 = arith.constant 0 : index
    %4 = vector.load %arg3[%c0_3, %c0_4] : memref<1x128xf32, #tpu.memory_space<vmem>>, vector<1x128xf32>
    %5 = vector.broadcast %4 : vector<1x128xf32> to vector<4x128xf32>
    %6 = arith.addf %3, %5 : vector<4x128xf32>
    %c0_5 = arith.constant 0 : index
    %c0_6 = arith.constant 0 : index
    %7 = vector.load %arg4[%c0_5, %c0_6] : memref<4x128xf32, #tpu.memory_space<vmem>>, vector<4x128xf32>
    tpu.vector_store %arg4[%c0_5, %c0_6], %6 {strides = array<i32>} : memref<4x128xf32, #tpu.memory_space<vmem>>, vector<4x128xf32>,
    return
  }
  func.func @transform_0(%arg0: i32) -> (i32, i32) {
    %c0_i32 = arith.constant 0 : i32
    %c0_i32_0 = arith.constant 0 : i32
    return %arg0, %c0_i32 : i32, i32
  }
  func.func @transform_1(%arg0: i32) -> (i32, i32) {
    %c0_i32 = arith.constant 0 : i32
    %c0_i32_0 = arith.constant 0 : i32
    %c0_i32_1 = arith.constant 0 : i32
    return %c0_i32, %c0_i32_0 : i32, i32
  }
  func.func @transform_2(%arg0: i32) -> (i32, i32) {
    %c0_i32 = arith.constant 0 : i32
    %c0_i32_0 = arith.constant 0 : i32
    %c0_i32_1 = arith.constant 0 : i32
    return %c0_i32, %c0_i32_0 : i32, i32
  }
  func.func @transform_3(%arg0: i32) -> (i32, i32) {
    %c0_i32 = arith.constant 0 : i32
    %c0_i32_0 = arith.constant 0 : i32
    return %arg0, %c0_i32 : i32, i32
  }
}

</mosaic_0001>

<bundles_post_ra>
// kernel: tpu_custom_call.1
= control target key start
LH: loop header
LB: loop body
LE: loop exit
PB: predicated region body
PF: predicated region fallthrough
CT: control target
= control target key end

     0   :  { %8 = vsyncpa [#allocation3], 0  ;;  %s676_s0 = inlined_call_operand.hbm [shape: f32[4,512], index: 0, kind: input, shape index: {}]   ;;  %s677_s1 = inlined_call_operand.hbm [shape: bf16[512,128], index: 1, kind: input, shape index: {}]   ;;  %s678_s2 = inlined_call_operand.vmem [shape: f32[1,128], index: 2, kind: input, shape index: {}]   ;;  %s679_s3 = inlined_call_operand.hbm [shape: f32[4,128], index: 3, kind: output, shape index: {}]  }
   0x1   :  { %9 = vsyncpa [#allocation6], 0 }
   0x2   :  { %10 = vsyncpa [#allocation4], 0  ;;  %s16_s14 = sshll.u32 %s676_s0, 4  ;;  %s639_s15 = smov [#allocation2]   ;;  %s17_s14 = int_to_ptr.hbm [resolvable:$true] %s16_s14 }
   0x3   :  { %s18_s16 = sshll.u32 %s639_s15, 4  ;;  %s26_s19 = sshll.u32 %s677_s1, 4  ;;  %s19_s16 = int_to_ptr.vmem [resolvable:$true] %s18_s16  ;;  %s27_s19 = int_to_ptr.hbm [resolvable:$true] %s26_s19 }
   0x4   :  { %21 = dma.hbm_to_vmem [thread:$0]  %s17_s14, 256, %s19_s16, [#allocation3]  }
   0x5   :  { %s640_s20 = smov [#allocation5]   ;;  %s641_s22 = smov 64  }
   0x6   :  { %s28_s21 = sshll.u32 %s640_s20, 4  ;;  %s642_s23 = smov 4   ;;  %s29_s21 = int_to_ptr.vmem [resolvable:$true] %s28_s21 }
   0x7   :  { %34 = dma.hbm_to_vmem [thread:$0]  %s27_s19, 4096, %s29_s21, [#allocation6], %s641_s22, %s641_s22, %s642_s23  }
   0x8   :  { %633 = dma.done.wait [#allocation3], 256  }
   0x9   :  { %634 = vsyncadd [#allocation3], 4294967040 }
   0xa   :  { %635 = dma.done.wait [#allocation6], 4096  }
   0xb   :  { %636 = vsyncadd [#allocation6], 4294963200  ;;  %v530_v0 = vld [vmem:[#allocation5 + $0x38] sm:$0xff]  ;;  %v529_v4 = vld [vmem:[#allocation5 + $0x30] sm:$0xff]  ;;  %s643_s24 = smov [#allocation7]   ;;  %s384_s28 = sshll.u32 %s679_s3, 4  ;;  %s385_s28 = int_to_ptr.hbm [resolvable:$true] %s384_s28 }
   0xc   :  { %v538_v1 = vld [vmem:[#allocation5 + $0x78] sm:$0xff]  ;;  %324 = vmatpush.bf16.msra.mxu0 %v530_v0  ;;  %v537_v5 = vld [vmem:[#allocation5 + $0x70] sm:$0xff]  ;;  %v528_v8 = vld [vmem:[#allocation5 + $0x28] sm:$0xff]  ;;  %s382_s25 = sshll.u32 %s643_s24, 4  ;;  %s383_s25 = int_to_ptr.vmem [resolvable:$true] %s382_s25 }
   0xd   :  { %v546_v2 = vld [vmem:[#allocation5 + $0xb8] sm:$0xff]  ;;  %337 = vmatpush.bf16.msra.mxu1 %v538_v1  ;;  %v545_v6 = vld [vmem:[#allocation5 + $0xb0] sm:$0xff]  ;;  %v536_v9 = vld [vmem:[#allocation5 + $0x68] sm:$0xff] }
   0xe   :  { %v554_v3 = vld [vmem:[#allocation5 + $0xf8] sm:$0xff]  ;;  %350 = vmatpush.bf16.msra.mxu2 %v546_v2  ;;  %v553_v7 = vld [vmem:[#allocation5 + $0xf0] sm:$0xff]  ;;  %v544_v10 = vld [vmem:[#allocation5 + $0xa8] sm:$0xff] }
   0xf   :  { %363 = vmatpush.bf16.msra.mxu3 %v554_v3  ;;  %v552_v11 = vld [vmem:[#allocation5 + $0xe8] sm:$0xff]  ;;  %v527_v12 = vld [vmem:[#allocation5 + $0x20] sm:$0xff]  ;;  %v45_v15 = vld [vmem:[#allocation2] sm:$0xff] }
  0x10   :  { %325 = vmatpush.bf16.msra.mxu0 %v529_v4  ;;  %v535_v13 = vld [vmem:[#allocation5 + $0x60] sm:$0xff]  ;;  %49 = vst [vmem:[#allocation1] ss:$2 sm:$0xff] %v45_v15  ;;  %v46_v17 = vld [vmem:[#allocation2 + $0x8] sm:$0xff]  ;;  %v525_v22 = vld [vmem:[#allocation5 + $0x10] sm:$0xff] }
  0x11   :  { %338 = vmatpush.bf16.msra.mxu1 %v537_v5  ;;  %v543_v14 = vld [vmem:[#allocation5 + $0xa0] sm:$0xff]  ;;  %51 = vst [vmem:[#allocation1 + $0x10] ss:$2 sm:$0xff] %v46_v17  ;;  %v526_v18 = vld [vmem:[#allocation5 + $0x18] sm:$0xff]  ;;  %v533_v23 = vld [vmem:[#allocation5 + $0x50] sm:$0xff] }
  0x12   :  { %351 = vmatpush.bf16.msra.mxu2 %v545_v6  ;;  %v551_v16 = vld [vmem:[#allocation5 + $0xe0] sm:$0xff]  ;;  %v534_v19 = vld [vmem:[#allocation5 + $0x58] sm:$0xff]  ;;  %v541_v24 = vld [vmem:[#allocation5 + $0x90] sm:$0xff] }
  0x13   :  { %364 = vmatpush.bf16.msra.mxu3 %v553_v7  ;;  %v542_v20 = vld [vmem:[#allocation5 + $0x98] sm:$0xff]  ;;  %v549_v25 = vld [vmem:[#allocation5 + $0xd0] sm:$0xff]  ;;  %v524_v26 = vld [vmem:[#allocation5 + $0x8] sm:$0xff] }
  0x14   :  { %326 = vmatpush.bf16.msra.mxu0 %v528_v8  ;;  %v550_v21 = vld [vmem:[#allocation5 + $0xd8] sm:$0xff]  ;;  %v532_v27 = vld [vmem:[#allocation5 + $0x48] sm:$0xff]  ;;  %v523_v30 = vld [vmem:[#allocation5] sm:$0xff] }
  0x15   :  { %339 = vmatpush.bf16.msra.mxu1 %v536_v9  ;;  %v540_v28 = vld [vmem:[#allocation5 + $0x88] sm:$0xff]  ;;  %v531_v31 = vld [vmem:[#allocation5 + $0x40] sm:$0xff] }
  0x16   :  { %352 = vmatpush.bf16.msra.mxu2 %v544_v10  ;;  %v548_v29 = vld [vmem:[#allocation5 + $0xc8] sm:$0xff]  ;;  %v539_v32 = vld [vmem:[#allocation5 + $0x80] sm:$0xff] }
  0x17   :  { %365 = vmatpush.bf16.msra.mxu3 %v552_v11  ;;  %v547_v33 = vld [vmem:[#allocation5 + $0xc0] sm:$0xff]  ;;  %v52_v34 = vld.sshfl [vmem:[#allocation1] sm:$0xff pattern:$0x75316420] }
  0x18   :  { %327 = vmatpush.bf16.msra.mxu0 %v527_v12  ;;  %v53_v35 = vld.sshfl [vmem:[#allocation1 + $0x8] sm:$0xff pattern:$0x75316420]  ;;  %v54_v36 = vld.sshfl [vmem:[#allocation1 + $0x10] sm:$0xff pattern:$0x75316420]  ;;  %v60_v38 = vpack.c.bf16 %v52_v34, %v52_v34 }
  0x19   :  { %340 = vmatpush.bf16.msra.mxu1 %v535_v13  ;;  %v55_v37 = vld.sshfl [vmem:[#allocation1 + $0x18] sm:$0xff pattern:$0x75316420]  ;;  %v61_v39 = vpack.c.bf16 %v53_v35, %v53_v35  ;;  %v62_v40 = vpack.c.bf16 %v54_v36, %v54_v36  ;;  %v560_v42 = vld [vmem:[%s678_s2] ss:$0 sm:$0xff] }
  0x1a   :  { %353 = vmatpush.bf16.msra.mxu2 %v543_v14  ;;  %v63_v41 = vpack.c.bf16 %v55_v37, %v55_v37 }
  0x1b   :  { %366 = vmatpush.bf16.msra.mxu3 %v551_v16 }
  0x1c   :  { %328 = vmatpush.bf16.msra.mxu0 %v526_v18 }
  0x1d   :  { %341 = vmatpush.bf16.msra.mxu1 %v534_v19 }
  0x1e   :  { %354 = vmatpush.bf16.msra.mxu2 %v542_v20 }
  0x1f   :  { %367 = vmatpush.bf16.msra.mxu3 %v550_v21 }
  0x20   :  { %329 = vmatpush.bf16.msra.mxu0 %v525_v22 }
  0x21   :  { %342 = vmatpush.bf16.msra.mxu1 %v533_v23 }
  0x22   :  { %355 = vmatpush.bf16.msra.mxu2 %v541_v24 }
  0x23   :  { %368 = vmatpush.bf16.msra.mxu3 %v549_v25 }
  0x24   :  { %330 = vmatpush.bf16.msra.mxu0 %v524_v26 }
  0x25   :  { %343 = vmatpush.bf16.msra.mxu1 %v532_v27 }
  0x26   :  { %356 = vmatpush.bf16.msra.mxu2 %v540_v28 }
  0x27   :  { %369 = vmatpush.bf16.msra.mxu3 %v548_v29 }
  0x28   :  { %331 = vmatpush.bf16.msra.mxu0 %v523_v30 }
  0x29   :  { %344 = vmatpush.bf16.msra.mxu1 %v531_v31 }
  0x2a   :  { %357 = vmatpush.bf16.msra.mxu2 %v539_v32 }
  0x2b   :  { %370 = vmatpush.bf16.msra.mxu3 %v547_v33  ;;  %332 = vmatmul.bf16.vlgmr.msra.gmra.mxu0 %v60_v38 }
  0x2c   :  { %345 = vmatmul.bf16.vlgmr.msra.gmra.mxu1 %v61_v39 }
  0x2d   :  { %358 = vmatmul.bf16.vlgmr.msra.gmra.mxu2 %v62_v40 }
  0x2e   :  { %371 = vmatmul.bf16.vlgmr.msra.gmra.mxu3 %v63_v41 }
  0xa8   :  { %v333_v43 = vpop.f32.mrf.mxu0 }
  0xa9   :  { %v346_v44 = vpop.f32.mrf.mxu1  ;;  %v334_v45 = vadd.f32 %v560_v42, %v333_v43 }
  0xab   :  { %v347_v46 = vadd.f32 %v346_v44, %v334_v45 }
  0xb0   :  { %v359_v47 = vpop.f32.mrf.mxu2  ;;  %v335_v50 = vpop.f32.mrf.mxu0 }
  0xb1   :  { %v372_v48 = vpop.f32.mrf.mxu3  ;;  %v360_v49 = vadd.f32 %v359_v47, %v347_v46  ;;  %v348_v51 = vpop.f32.mrf.mxu1 }
  0xb3   :  { %v373_v52 = vadd.f32 %v372_v48, %v360_v49 }
  0xb5   :  { %376 = vst [vmem:[#allocation7] sm:$0xf] %v373_v52 }
  0xb6   :  { %387 = dma.vmem_to_hbm [thread:$0]  %s383_s25, 64, %s385_s28, [#allocation4]  }
  0xb8   :  { %v361_v53 = vpop.f32.mrf.mxu2 }
  0xb9   :  { %v374_v54 = vpop.f32.mrf.mxu3 }
  0xba   :  { %637 = dma.done.wait [#allocation4], 64  }
  0xbb   :  { %638 = vsyncadd [#allocation4], 4294967232 }
  0xbc   :  { %392 = vsyncpa [#allocation3], 1 }
  0xbd   :  { %393 = vsyncpa [#allocation6], 1 }
  0xbe   :  { %394 = vsyncpa [#allocation4], 1 }

</bundles_post_ra>
